<compile_context>
chip_gen: v7x
topology: tpu7x:2x2x1
jax: 0.10.0
libtpu: 0.0.40
codegen_flags: <defaults>
</compile_context>

<pallas_src>
import functools
import math

import jax
import jax.numpy as jnp
from jax.experimental import pallas as pl
from jax.experimental.pallas import tpu as pltpu


def _round_up(x, m):
    return (x + m - 1) // m * m


def _mhsa_kernel(q_ref, h_ref, w_ref, o_ref, *, batch_tile):
    """One grid step: `batch_tile` batch rows x one query tile x one graph tile.

    q_ref: [Bt, TQ,  IDp]  (compute dtype)
    h_ref: [Bt, TGS, IDp]  (compute dtype)
    w_ref: [IDp, IDp]      (compute dtype)  -- folded (norm/H) * sum_h Wq_h Wk_h^T
    o_ref: [Bt, TQ,  TGS]  (float32)
    """
    w = w_ref[...]                      # resident weight, hoisted out of the loop
    for b in range(batch_tile):         # static & small (<=8) -> unrolled; each
        qb = q_ref[b]                   # iteration stores immediately (no acc
        hb = h_ref[b]                   # live-range buildup).
        # q projection through the folded weight (f32 MXU accumulation).
        qe = jnp.dot(qb, w, preferred_element_type=jnp.float32)          # [TQ, IDp]
        # scores = qe @ hb^T (contract the lane-padded input_dim axis).
        s = jax.lax.dot_general(
            qe.astype(hb.dtype), hb,
            dimension_numbers=(((1,), (1,)), ((), ())),
            preferred_element_type=jnp.float32)                          # [TQ, TGS]
        # f32 epilogue (EUP tanh; kept f32 for v5e which lacks bf16 VPU/EUP),
        # lane-dense f32 store.
        o_ref[b] = jnp.tanh(s) * 10.0


def multi_head_self_attention(q, h, w_query, w_key, *,
                              tile_q=256, tile_gs=512,
                              compute_dtype=jnp.bfloat16,
                              batch_tile_cap=8):
    """q: [B, NQ, ID], h: [B, GS, ID] (None -> q), w_*: [H, ID, KD] -> [B, NQ, GS] f32."""
    if h is None:
        h = q
    B, NQ, ID = q.shape
    _, GS, ID_h = h.shape
    H, ID2, KD = w_query.shape
    assert ID_h == ID and ID2 == ID and w_key.shape == (H, ID, KD)
    norm = 1.0 / math.sqrt(KD)

    # ---- Head fold: W_eff = (norm/H) * sum_h Wq[h] @ Wk[h]^T  ([ID, ID]) ----
    w_eff = jnp.einsum(
        'hik,hjk->ij',
        w_query.astype(jnp.float32), w_key.astype(jnp.float32),
        precision=jax.lax.Precision.HIGHEST) * (norm / H)

    # ---- Tiling: lane dims -> multiples of 128, sublane dims -> 8 ------------
    IDp = _round_up(ID, 128)
    TQ = min(_round_up(NQ, 8), _round_up(tile_q, 8))
    NQp = _round_up(NQ, TQ)
    TGS = min(_round_up(GS, 128), _round_up(tile_gs, 128))
    GSp = _round_up(GS, TGS)

    comp_bytes = jnp.dtype(compute_dtype).itemsize
    # Batch elements per grid step (amortize per-step overhead for tiny per-batch
    # work), bounded by a VMEM budget for the double-buffered blocks.
    per_batch = 2 * (TQ * IDp * comp_bytes + TGS * IDp * comp_bytes + TQ * TGS * 4)
    bt_cap = int(max(1, min(batch_tile_cap, (12 << 20) // max(per_batch, 1), B)))
    Bt = max(bt for bt in range(1, bt_cap + 1) if B % bt == 0)

    # ---- Pad (skipped when already aligned; exact: zero rows/cols) -----------
    # (A further option is CompilerParams(allow_input_fusion=...) so XLA fuses
    #  the pad into the pallas_call inputs.)
    def pad_to(x, shape):
        pads = [(0, t - s) for s, t in zip(x.shape, shape)]
        return jnp.pad(x, pads) if any(p for _, p in pads) else x

    qp = pad_to(q.astype(compute_dtype), (B, NQp, IDp))
    hp = pad_to(h.astype(compute_dtype), (B, GSp, IDp))
    wp = pad_to(w_eff.astype(compute_dtype), (IDp, IDp))

    # ---- Explicit VMEM budget (v5e scoped default 16 MiB; v7x physical 64 MiB)
    need = 2 * (Bt * TQ * IDp * comp_bytes + Bt * TGS * IDp * comp_bytes
                + Bt * TQ * TGS * 4 + IDp * IDp * comp_bytes)
    vmem_limit = int(min(max(need + (8 << 20), 32 << 20), 56 << 20))

    kernel = functools.partial(_mhsa_kernel, batch_tile=Bt)

    out = pl.pallas_call(
        kernel,
        out_shape=jax.ShapeDtypeStruct((B, NQp, GSp), jnp.float32),
        grid_spec=pltpu.PrefetchScalarGridSpec(
            num_scalar_prefetch=0,
            grid=(B // Bt, NQp // TQ, GSp // TGS),
            in_specs=[
                pl.BlockSpec((Bt, TQ, IDp), lambda b, i, g: (b, i, 0)),    # q tile
                pl.BlockSpec((Bt, TGS, IDp), lambda b, i, g: (b, g, 0)),   # h tile
                pl.BlockSpec((IDp, IDp), lambda b, i, g: (0, 0)),          # W_eff (resident)
            ],
            out_specs=pl.BlockSpec((Bt, TQ, TGS), lambda b, i, g: (b, i, g)),
        ),
        compiler_params=pltpu.CompilerParams(
            dimension_semantics=("parallel", "parallel", "parallel"),
            vmem_limit_bytes=vmem_limit),
    )(qp, hp, wp)

    return out[:, :NQ, :GS]


def _reference(q, h, w_query, w_key):
    """Pure-JAX reference mirroring the PyTorch forward (per-head, then mean)."""
    KD = w_query.shape[-1]
    norm = 1.0 / math.sqrt(KD)
    hi = jax.lax.Precision.HIGHEST
    Q = jnp.einsum('bnd,hdk->hbnk', q, w_query, precision=hi)
    K = jnp.einsum('bgd,hdk->hbgk', h, w_key, precision=hi)
    s = norm * jnp.einsum('hbnk,hbgk->hbng', Q, K, precision=hi)
    return jnp.tanh(jnp.mean(s, axis=0)) * 10.0


if __name__ == "__main__":
    key = jax.random.PRNGKey(0)
    k_q, k_wq, k_wk = jax.random.split(key, 3)

    B, NQ, ID = 2, 8, 32        # batch, num_query, input_dim
    H, EMB = 2, 32              # num_heads, embed_dim
    KD = EMB // H               # key_dim = val_dim = 16

    q = jax.random.normal(k_q, (B, NQ, ID), dtype=jnp.float32)
    stdv = 1.0 / math.sqrt(KD)  # matches init_parameters(): uniform(-stdv, stdv)
    w_query = jax.random.uniform(k_wq, (H, ID, KD), jnp.float32, -stdv, stdv)
    w_key = jax.random.uniform(k_wk, (H, ID, KD), jnp.float32, -stdv, stdv)

    ref = _reference(q, q, w_query, w_key)

    # f32-operand path (closest to the PyTorch f32 forward).
    out_f32 = jax.block_until_ready(
        multi_head_self_attention(q, None, w_query, w_key,
                                  compute_dtype=jnp.float32))
    assert out_f32.shape == (B, NQ, NQ)
    assert jnp.allclose(out_f32, ref, atol=5e-3, rtol=5e-3), "f32 mismatch vs reference"

    # Default bf16-operand path (MXU-native on v6e/v7x; f32 accumulation + epilogue).
    out_bf16 = jax.block_until_ready(
        multi_head_self_attention(q, None, w_query, w_key))
    assert out_bf16.shape == (B, NQ, NQ)
    assert jnp.allclose(out_bf16, ref, atol=8e-2, rtol=3e-2), "bf16 mismatch vs reference"

    print("KERNEL_OK")
</pallas_src>

<mosaic_0001>
module attributes {stable_mosaic.version = 11 : i64} {
  func.func @_mhsa_kernel(%arg0: i32, %arg1: i32, %arg2: i32, %arg3: memref<2x8x128xf32, #tpu.memory_space<vmem>>, %arg4: memref<2x128x128xf32, #tpu.memory_space<vmem>>, %arg5: memref<128x128xf32, #tpu.memory_space<vmem>>, %arg6: memref<2x8x128xf32, #tpu.memory_space<vmem>>) attributes {dimension_semantics = [#tpu.dimension_semantics<parallel>, #tpu.dimension_semantics<parallel>, #tpu.dimension_semantics<parallel>], iteration_bounds = array<i64: 1, 1, 1>, scalar_prefetch = 0 : i64, scratch_operands = 0 : i64, tpu.core_type = #tpu.core_type<tc>, window_params = [{transform_indices = @transform_0, window_bounds = array<i64: 2, 8, 128>}, {transform_indices = @transform_1, window_bounds = array<i64: 2, 128, 128>}, {pipeline_mode = #tpu.pipeline_mode<synchronous>, transform_indices = @transform_2, window_bounds = array<i64: 128, 128>}, {transform_indices = @transform_3, window_bounds = array<i64: 2, 8, 128>}]} {
    %c0 = arith.constant 0 : index
    %c0_0 = arith.constant 0 : index
    %0 = vector.load %arg5[%c0, %c0_0] : memref<128x128xf32, #tpu.memory_space<vmem>>, vector<128x128xf32>
    %c0_1 = arith.constant 0 : index
    %c0_2 = arith.constant 0 : index
    %c0_3 = arith.constant 0 : index
    %1 = vector.load %arg3[%c0_1, %c0_2, %c0_3] : memref<2x8x128xf32, #tpu.memory_space<vmem>>, vector<1x8x128xf32>
    %2 = vector.shape_cast %1 : vector<1x8x128xf32> to vector<8x128xf32>
    %c0_4 = arith.constant 0 : index
    %c0_5 = arith.constant 0 : index
    %c0_6 = arith.constant 0 : index
    %3 = vector.load %arg4[%c0_4, %c0_5, %c0_6] : memref<2x128x128xf32, #tpu.memory_space<vmem>>, vector<1x128x128xf32>
    %4 = vector.shape_cast %3 : vector<1x128x128xf32> to vector<128x128xf32>
    %cst = arith.constant dense<0.000000e+00> : vector<8x128xf32>
    %5 = tpu.matmul %2, %0, %cst {dimension_numbers = #tpu.dot_dimension_numbers<[1], [0], [0], [1], [0, 0, 1, 1], [], []>} : vector<8x128xf32>, vector<128x128xf32>, vector<8x128xf32> -> vector<8x128xf32>
    %cst_7 = arith.constant dense<0.000000e+00> : vector<8x128xf32>
    %6 = tpu.matmul %5, %4, %cst_7 {dimension_numbers = #tpu.dot_dimension_numbers<[1], [1], [0], [0], [0, 0, 1, 0], [], []>} : vector<8x128xf32>, vector<128x128xf32>, vector<8x128xf32> -> vector<8x128xf32>
    %7 = math.tanh %6 : vector<8x128xf32>
    %cst_8 = arith.constant 1.000000e+01 : f32
    %8 = vector.broadcast %cst_8 : f32 to vector<8x128xf32>
    %9 = arith.mulf %7, %8 : vector<8x128xf32>
    %c0_9 = arith.constant 0 : index
    %c0_10 = arith.constant 0 : index
    %c0_11 = arith.constant 0 : index
    %10 = vector.load %arg6[%c0_9, %c0_10, %c0_11] : memref<2x8x128xf32, #tpu.memory_space<vmem>>, vector<1x8x128xf32>
    %11 = vector.shape_cast %10 : vector<1x8x128xf32> to vector<8x128xf32>
    %12 = vector.shape_cast %9 : vector<8x128xf32> to vector<1x8x128xf32>
    tpu.vector_store %arg6[%c0_9, %c0_10, %c0_11], %12 {strides = array<i32>} : memref<2x8x128xf32, #tpu.memory_space<vmem>>, vector<1x8x128xf32>,
    %c1 = arith.constant 1 : index
    %c0_12 = arith.constant 0 : index
    %c0_13 = arith.constant 0 : index
    %13 = vector.load %arg3[%c1, %c0_12, %c0_13] : memref<2x8x128xf32, #tpu.memory_space<vmem>>, vector<1x8x128xf32>
    %14 = vector.shape_cast %13 : vector<1x8x128xf32> to vector<8x128xf32>
    %c1_14 = arith.constant 1 : index
    %c0_15 = arith.constant 0 : index
    %c0_16 = arith.constant 0 : index
    %15 = vector.load %arg4[%c1_14, %c0_15, %c0_16] : memref<2x128x128xf32, #tpu.memory_space<vmem>>, vector<1x128x128xf32>
    %16 = vector.shape_cast %15 : vector<1x128x128xf32> to vector<128x128xf32>
    %cst_17 = arith.constant dense<0.000000e+00> : vector<8x128xf32>
    %17 = tpu.matmul %14, %0, %cst_17 {dimension_numbers = #tpu.dot_dimension_numbers<[1], [0], [0], [1], [0, 0, 1, 1], [], []>} : vector<8x128xf32>, vector<128x128xf32>, vector<8x128xf32> -> vector<8x128xf32>
    %cst_18 = arith.constant dense<0.000000e+00> : vector<8x128xf32>
    %18 = tpu.matmul %17, %16, %cst_18 {dimension_numbers = #tpu.dot_dimension_numbers<[1], [1], [0], [0], [0, 0, 1, 0], [], []>} : vector<8x128xf32>, vector<128x128xf32>, vector<8x128xf32> -> vector<8x128xf32>
    %19 = math.tanh %18 : vector<8x128xf32>
    %cst_19 = arith.constant 1.000000e+01 : f32
    %20 = vector.broadcast %cst_19 : f32 to vector<8x128xf32>
    %21 = arith.mulf %19, %20 : vector<8x128xf32>
    %c1_20 = arith.constant 1 : index
    %c0_21 = arith.constant 0 : index
    %c0_22 = arith.constant 0 : index
    %22 = vector.load %arg6[%c1_20, %c0_21, %c0_22] : memref<2x8x128xf32, #tpu.memory_space<vmem>>, vector<1x8x128xf32>
    %23 = vector.shape_cast %22 : vector<1x8x128xf32> to vector<8x128xf32>
    %24 = vector.shape_cast %21 : vector<8x128xf32> to vector<1x8x128xf32>
    tpu.vector_store %arg6[%c1_20, %c0_21, %c0_22], %24 {strides = array<i32>} : memref<2x8x128xf32, #tpu.memory_space<vmem>>, vector<1x8x128xf32>,
    return
  }
  func.func @transform_0(%arg0: i32, %arg1: i32, %arg2: i32) -> (i32, i32, i32) {
    %c0_i32 = arith.constant 0 : i32
    %c0_i32_0 = arith.constant 0 : i32
    return %arg0, %arg1, %c0_i32 : i32, i32, i32
  }
  func.func @transform_1(%arg0: i32, %arg1: i32, %arg2: i32) -> (i32, i32, i32) {
    %c0_i32 = arith.constant 0 : i32
    %c0_i32_0 = arith.constant 0 : i32
    return %arg0, %arg2, %c0_i32 : i32, i32, i32
  }
  func.func @transform_2(%arg0: i32, %arg1: i32, %arg2: i32) -> (i32, i32) {
    %c0_i32 = arith.constant 0 : i32
    %c0_i32_0 = arith.constant 0 : i32
    %c0_i32_1 = arith.constant 0 : i32
    return %c0_i32, %c0_i32_0 : i32, i32
  }
  func.func @transform_3(%arg0: i32, %arg1: i32, %arg2: i32) -> (i32, i32, i32) {
    %c0_i32 = arith.constant 0 : i32
    return %arg0, %arg1, %arg2 : i32, i32, i32
  }
}

</mosaic_0001>

<bundles_post_ra>
// kernel: tpu_custom_call.1
= control target key start
LH: loop header
LB: loop body
LE: loop exit
PB: predicated region body
PF: predicated region fallthrough
CT: control target
= control target key end

     0   :  { %8 = vsyncpa [#allocation3], 0  ;;  %s960_s0 = inlined_call_operand.hbm [shape: f32[2,8,128], index: 0, kind: input, shape index: {}]   ;;  %s961_s1 = inlined_call_operand.hbm [shape: f32[2,128,128], index: 1, kind: input, shape index: {}]   ;;  %s962_s2 = inlined_call_operand.hbm [shape: f32[128,128], index: 2, kind: input, shape index: {}]   ;;  %s963_s3 = inlined_call_operand.hbm [shape: f32[2,8,128], index: 3, kind: output, shape index: {}]  }
   0x1   :  { %9 = vsyncpa [#allocation6], 0 }
   0x2   :  { %10 = vsyncpa [#allocation4], 0  ;;  %s824_s12 = smov [#allocation5]   ;;  %s825_s14 = smov [#allocation2]  }
   0x3   :  { %s28_s13 = sshll.u32 %s824_s12, 4  ;;  %s16_s15 = sshll.u32 %s825_s14, 4  ;;  %s29_s13 = int_to_ptr.vmem [resolvable:$true] %s28_s13  ;;  %s853_s15 = int_to_ptr.vmem [resolvable:$true] %s16_s15 }
   0x4   :  { %s730_s18 = scalar_lea.hbm %s961_s1, 4096 }
   0x5   :  { %p731_p0 = scmp.ne.s32.totalorder %s961_s1, %s730_s18  ;;  %p734_p1 = scmp.lt.u32.totalorder %s730_s18, %s961_s1 }
   0x7   :  { %p736_p2 = pnand %p734_p1, %p731_p0 }
   0x9   :  { %739 = shalt.err (!%p736_p2)
}
   0xa   :  { %s740_s23 = scalar_lea.vmem %s29_s13, 4096  ;;  %p745_p4 = scmp.lt.s32.totalorder %s29_s13, %s29_s13 }
   0xb   :  { %p741_p3 = scmp.ne.s32.totalorder %s29_s13, %s740_s23  ;;  %p746_p5 = scmp.lt.s32.totalorder %s740_s23, %s740_s23 }
   0xd   :  { %p747_p6 = por %p746_p5, %p745_p4 }
   0xf   :  { %p748_p7 = pnand %p747_p6, %p741_p3 }
  0x11   :  { %751 = shalt.err (!%p748_p7)
}
  0x12   :  { %s826_s24 = smov 128   ;;  %s827_s25 = smov 8  }
  0x13   :  { %34 = dma.hbm_to_vmem [thread:$0]  %s961_s1, 4096, %s29_s13, [#allocation6], %s826_s24, %s826_s24, %s827_s25  }
  0x14   :  { %s752_s30 = scalar_lea.hbm %s960_s0, 256 }
  0x15   :  { %p753_p8 = scmp.ne.s32.totalorder %s960_s0, %s752_s30  ;;  %p756_p9 = scmp.lt.u32.totalorder %s752_s30, %s960_s0 }
  0x17   :  { %p758_p10 = pnand %p756_p9, %p753_p8 }
  0x19   :  { %761 = shalt.err (!%p758_p10)
}
  0x1a   :  { %s762_s8 = scalar_lea.vmem %s853_s15, 256  ;;  %p767_p12 = scmp.lt.s32.totalorder %s853_s15, %s853_s15 }
  0x1b   :  { %p763_p11 = scmp.ne.s32.totalorder %s853_s15, %s762_s8  ;;  %p768_p13 = scmp.lt.s32.totalorder %s762_s8, %s762_s8 }
  0x1d   :  { %p769_p0 = por %p768_p13, %p767_p12 }
  0x1f   :  { %p770_p1 = pnand %p769_p0, %p763_p11 }
  0x21   :  { %773 = shalt.err (!%p770_p1)
}
  0x22   :  { %22 = dma.hbm_to_vmem [thread:$0]  %s960_s0, 256, %s853_s15, [#allocation3], %s826_s24, %s826_s24, %s827_s25  }
  0x23   :  { %s828_s10 = smov [#allocation7]   ;;  %s774_s14 = scalar_lea.hbm %s962_s2, 2048 }
  0x24   :  { %s40_s11 = sshll.u32 %s828_s10, 4  ;;  %p775_p2 = scmp.ne.s32.totalorder %s962_s2, %s774_s14  ;;  %s41_s11 = int_to_ptr.vmem [resolvable:$true] %s40_s11 }
  0x25   :  { %p778_p3 = scmp.lt.u32.totalorder %s774_s14, %s962_s2 }
  0x27   :  { %p780_p4 = pnand %p778_p3, %p775_p2 }
  0x29   :  { %783 = shalt.err (!%p780_p4)
}
  0x2a   :  { %s784_s20 = scalar_lea.vmem %s41_s11, 2048  ;;  %p789_p6 = scmp.lt.s32.totalorder %s41_s11, %s41_s11 }
  0x2b   :  { %p785_p5 = scmp.ne.s32.totalorder %s41_s11, %s784_s20  ;;  %p790_p7 = scmp.lt.s32.totalorder %s784_s20, %s784_s20 }
  0x2d   :  { %p791_p8 = por %p790_p7, %p789_p6 }
  0x2f   :  { %p792_p9 = pnand %p791_p8, %p785_p5 }
  0x31   :  { %795 = shalt.err (!%p792_p9)
}
  0x32   :  { %46 = dma.hbm_to_vmem [thread:$0]  %s962_s2, 2048, %s41_s11, [#allocation6], %s826_s24, %s826_s24, %s827_s25  }
  0x33   :  { %818 = dma.done.wait [#allocation3], 256  }
  0x34   :  { %819 = vsyncadd [#allocation3], 4294967040 }
  0x35   :  { %820 = dma.done.wait [#allocation6], 6144  }
  0x36   :  { %821 = vsyncadd [#allocation6], 4294961152  ;;  %v829_v0 = vmov 0.0|0.0   ;;  %vm830_vm0 = vmmov 0   ;;  %v831_v1 = vmov 0.0   ;;  %v56_v2 = vld [vmem:[#allocation7] sm:$0xff] }
  0x37   :  { %621 = vmatprep.subr.bf16.mxu1 %v829_v0  ;;  %669 = vmatprep.subr.bf16.mxu0 %v829_v0  ;;  %v57_v3 = vld [vmem:[#allocation7 + $0x8] sm:$0xff]  ;;  %v58_v4 = vld [vmem:[#allocation7 + $0x10] sm:$0xff]  ;;  %v59_v6 = vld [vmem:[#allocation7 + $0x18] sm:$0xff]  ;;  %s832_s2 = smov [#allocation8]  }
  0x38   :  { %513 = vmatprep.mubr.msk.f32.mxu1 %vm830_vm0, %v831_v1  ;;  %583 = vmatprep.mubr.msk.f32.mxu0 %vm830_vm0, %v831_v1  ;;  %v622_v5 = vpack.c.bf16 %v57_v3, %v56_v2  ;;  %v625_v7 = vpack.c.bf16 %v59_v6, %v58_v4  ;;  %v60_v8 = vld [vmem:[#allocation7 + $0x20] sm:$0xff]  ;;  %v61_v9 = vld [vmem:[#allocation7 + $0x28] sm:$0xff]  ;;  %v62_v11 = vld [vmem:[#allocation7 + $0x30] sm:$0xff]  ;;  %s400_s21 = sshll.u32 %s832_s2, 4  ;;  %s401_s21 = int_to_ptr.vmem [resolvable:$true] %s400_s21 }
  0x39   :  { %v628_v10 = vpack.c.bf16 %v61_v9, %v60_v8  ;;  %v63_v12 = vld [vmem:[#allocation7 + $0x38] sm:$0xff]  ;;  %v64_v14 = vld [vmem:[#allocation7 + $0x40] sm:$0xff]  ;;  %v65_v15 = vld [vmem:[#allocation7 + $0x48] sm:$0xff]  ;;  %s796_s22 = scalar_lea.vmem %s401_s21, 256  ;;  %p801_p11 = scmp.lt.s32.totalorder %s401_s21, %s401_s21 }
  0x3a   :  { %623 = vmatpush3.bf16.msra.mxu1 %v622_v5  ;;  %671 = vmatpush3.bf16.msra.mxu0 %v622_v5  ;;  %v631_v13 = vpack.c.bf16 %v63_v12, %v62_v11  ;;  %v634_v16 = vpack.c.bf16 %v65_v15, %v64_v14  ;;  %v66_v17 = vld [vmem:[#allocation7 + $0x50] sm:$0xff]  ;;  %v67_v18 = vld [vmem:[#allocation7 + $0x58] sm:$0xff]  ;;  %v68_v20 = vld [vmem:[#allocation7 + $0x60] sm:$0xff]  ;;  %p797_p10 = scmp.ne.s32.totalorder %s401_s21, %s796_s22  ;;  %p802_p12 = scmp.lt.s32.totalorder %s796_s22, %s796_s22 }
  0x3b   :  { %624 = vmatprep.subr.bf16.mxu1 %v829_v0  ;;  %672 = vmatprep.subr.bf16.mxu0 %v829_v0  ;;  %v637_v19 = vpack.c.bf16 %v67_v18, %v66_v17  ;;  %v69_v21 = vld [vmem:[#allocation7 + $0x68] sm:$0xff]  ;;  %v70_v23 = vld [vmem:[#allocation7 + $0x70] sm:$0xff]  ;;  %v71_v24 = vld [vmem:[#allocation7 + $0x78] sm:$0xff] }
  0x3c   :  { %v640_v22 = vpack.c.bf16 %v69_v21, %v68_v20  ;;  %v643_v25 = vpack.c.bf16 %v71_v24, %v70_v23  ;;  %v72_v26 = vld [vmem:[#allocation2] sm:$0xff]  ;;  %v233_v27 = vld [vmem:[#allocation2 + $0x8] sm:$0xff]  ;;  %v73_v28 = vld [vmem:[#allocation5] sm:$0xff]  ;;  %p803_p13 = por %p802_p12, %p801_p11 }
  0x3d   :  { %v74_v29 = vld [vmem:[#allocation5 + $0x8] sm:$0xff]  ;;  %v235_v30 = vld [vmem:[#allocation5 + $0x80] sm:$0xff]  ;;  %v75_v34 = vld [vmem:[#allocation5 + $0x10] sm:$0xff] }
  0x3e   :  { %626 = vmatpush3.bf16.msra.mxu1 %v625_v7  ;;  %674 = vmatpush3.bf16.msra.mxu0 %v625_v7  ;;  %v236_v31 = vld [vmem:[#allocation5 + $0x88] sm:$0xff]  ;;  %v646_v32 = vpack.c.bf16 %v74_v29, %v73_v28  ;;  %v76_v35 = vld [vmem:[#allocation5 + $0x18] sm:$0xff]  ;;  %v237_v36 = vld [vmem:[#allocation5 + $0x90] sm:$0xff]  ;;  %p804_p0 = pnand %p803_p13, %p797_p10 }
  0x3f   :  { %627 = vmatprep.subr.bf16.mxu1 %v829_v0  ;;  %675 = vmatprep.subr.bf16.mxu0 %v829_v0  ;;  %v694_v33 = vpack.c.bf16 %v236_v31, %v235_v30  ;;  %v238_v37 = vld [vmem:[#allocation5 + $0x98] sm:$0xff]  ;;  %v649_v38 = vpack.c.bf16 %v76_v35, %v75_v34  ;;  %v77_v40 = vld [vmem:[#allocation5 + $0x20] sm:$0xff]  ;;  %v78_v41 = vld [vmem:[#allocation5 + $0x28] sm:$0xff] }
  0x40   :  { %v697_v39 = vpack.c.bf16 %v238_v37, %v237_v36  ;;  %v239_v42 = vld [vmem:[#allocation5 + $0xa0] sm:$0xff]  ;;  %v240_v43 = vld [vmem:[#allocation5 + $0xa8] sm:$0xff]  ;;  %v652_v44 = vpack.c.bf16 %v78_v41, %v77_v40  ;;  %v79_v46 = vld [vmem:[#allocation5 + $0x30] sm:$0xff] }
  0x41   :  { %v700_v45 = vpack.c.bf16 %v240_v43, %v239_v42  ;;  %v80_v47 = vld [vmem:[#allocation5 + $0x38] sm:$0xff]  ;;  %v241_v48 = vld [vmem:[#allocation5 + $0xb0] sm:$0xff]  ;;  %v81_v52 = vld [vmem:[#allocation5 + $0x40] sm:$0xff] }
  0x42   :  { %629 = vmatpush3.bf16.msra.mxu1 %v628_v10  ;;  %677 = vmatpush3.bf16.msra.mxu0 %v628_v10  ;;  %v242_v49 = vld [vmem:[#allocation5 + $0xb8] sm:$0xff]  ;;  %v655_v50 = vpack.c.bf16 %v80_v47, %v79_v46  ;;  %v82_v53 = vld [vmem:[#allocation5 + $0x48] sm:$0xff]  ;;  %v243_v54 = vld [vmem:[#allocation5 + $0xc0] sm:$0xff] }
  0x43   :  { %630 = vmatprep.subr.bf16.mxu1 %v829_v0  ;;  %678 = vmatprep.subr.bf16.mxu0 %v829_v0  ;;  %v703_v51 = vpack.c.bf16 %v242_v49, %v241_v48  ;;  %v244_v55 = vld [vmem:[#allocation5 + $0xc8] sm:$0xff]  ;;  %v658_v56 = vpack.c.bf16 %v82_v53, %v81_v52  ;;  %v83_v58 = vld [vmem:[#allocation5 + $0x50] sm:$0xff]  ;;  %v84_v59 = vld [vmem:[#allocation5 + $0x58] sm:$0xff] }
  0x44   :  { %v706_v57 = vpack.c.bf16 %v244_v55, %v243_v54  ;;  %v245_v60 = vld [vmem:[#allocation5 + $0xd0] sm:$0xff]  ;;  %v246_v61 = vld [vmem:[#allocation5 + $0xd8] sm:$0xff]  ;;  %v661_v62 = vpack.c.bf16 %v84_v59, %v83_v58  ;;  %v86_v2 = vld [vmem:[#allocation5 + $0x68] sm:$0xff] }
  0x45   :  { %v709_v63 = vpack.c.bf16 %v246_v61, %v245_v60  ;;  %v247_v3 = vld [vmem:[#allocation5 + $0xe0] sm:$0xff]  ;;  %v248_v4 = vld [vmem:[#allocation5 + $0xe8] sm:$0xff]  ;;  %v87_v7 = vld [vmem:[#allocation5 + $0x70] sm:$0xff] }
  0x46   :  { %632 = vmatpush3.bf16.msra.mxu1 %v631_v13  ;;  %680 = vmatpush3.bf16.msra.mxu0 %v631_v13  ;;  %v712_v6 = vpack.c.bf16 %v248_v4, %v247_v3  ;;  %v88_v8 = vld [vmem:[#allocation5 + $0x78] sm:$0xff]  ;;  %v249_v9 = vld [vmem:[#allocation5 + $0xf0] sm:$0xff] }
  0x47   :  { %633 = vmatprep.subr.bf16.mxu1 %v829_v0  ;;  %681 = vmatprep.subr.bf16.mxu0 %v829_v0  ;;  %v250_v10 = vld [vmem:[#allocation5 + $0xf8] sm:$0xff]  ;;  %v667_v11 = vpack.c.bf16 %v88_v8, %v87_v7 }
  0x48   :  { %v715_v12 = vpack.c.bf16 %v250_v10, %v249_v9 }
  0x4a   :  { %635 = vmatpush3.bf16.msra.mxu1 %v634_v16  ;;  %683 = vmatpush3.bf16.msra.mxu0 %v634_v16 }
  0x4b   :  { %636 = vmatprep.subr.bf16.mxu1 %v829_v0  ;;  %684 = vmatprep.subr.bf16.mxu0 %v829_v0 }
  0x4e   :  { %638 = vmatpush3.bf16.msra.mxu1 %v637_v19  ;;  %686 = vmatpush3.bf16.msra.mxu0 %v637_v19 }
  0x4f   :  { %639 = vmatprep.subr.bf16.mxu1 %v829_v0  ;;  %687 = vmatprep.subr.bf16.mxu0 %v829_v0 }
  0x52   :  { %641 = vmatpush3.bf16.msra.mxu1 %v640_v22  ;;  %689 = vmatpush3.bf16.msra.mxu0 %v640_v22 }
  0x53   :  { %642 = vmatprep.subr.bf16.mxu1 %v829_v0  ;;  %690 = vmatprep.subr.bf16.mxu0 %v829_v0 }
  0x56   :  { %644 = vmatpush3.bf16.msra.mxu1 %v643_v25  ;;  %692 = vmatpush3.bf16.msra.mxu0 %v643_v25 }
  0x57   :  { %645 = vmatprep.subr.bf16.mxu1 %v829_v0  ;;  %693 = vmatprep.subr.bf16.mxu0 %v829_v0 }
  0x59   :  { %514 = vmatmul.mubr.f32.vlgmr.msra.gmra.mrb[0].mxu1 %v72_v26  ;;  %584 = vmatmul.mubr.f32.vlgmr.msra.gmra.mrb[0].mxu0 %v233_v27 }
  0x5a   :  { %548 = vmatprep.mubr.msk.f32.mxu1 %vm830_vm0, %v831_v1  ;;  %618 = vmatprep.mubr.msk.f32.mxu0 %vm830_vm0, %v831_v1  ;;  %v85_v1 = vld [vmem:[#allocation5 + $0x60] sm:$0xff] }
  0x5b   :  { %v664_v5 = vpack.c.bf16 %v86_v2, %v85_v1 }
  0x5f   :  { %647 = vmatpush3.bf16.xpose.msra.mxu1 %v646_v32  ;;  %695 = vmatpush3.bf16.xpose.msra.mxu0 %v694_v33 }
  0x60   :  { %648 = vmatprep.subr.bf16.mxu1 %v829_v0  ;;  %696 = vmatprep.subr.bf16.mxu0 %v829_v0 }
  0x67   :  { %650 = vmatpush3.bf16.xpose.msra.mxu1 %v649_v38  ;;  %698 = vmatpush3.bf16.xpose.msra.mxu0 %v697_v39 }
  0x68   :  { %651 = vmatprep.subr.bf16.mxu1 %v829_v0  ;;  %699 = vmatprep.subr.bf16.mxu0 %v829_v0 }
  0x6f   :  { %653 = vmatpush3.bf16.xpose.msra.mxu1 %v652_v44  ;;  %701 = vmatpush3.bf16.xpose.msra.mxu0 %v700_v45 }
  0x70   :  { %654 = vmatprep.subr.bf16.mxu1 %v829_v0  ;;  %702 = vmatprep.subr.bf16.mxu0 %v829_v0 }
  0x77   :  { %656 = vmatpush3.bf16.xpose.msra.mxu1 %v655_v50  ;;  %704 = vmatpush3.bf16.xpose.msra.mxu0 %v703_v51 }
  0x78   :  { %657 = vmatprep.subr.bf16.mxu1 %v829_v0  ;;  %705 = vmatprep.subr.bf16.mxu0 %v829_v0 }
  0x7f   :  { %659 = vmatpush3.bf16.xpose.msra.mxu1 %v658_v56  ;;  %707 = vmatpush3.bf16.xpose.msra.mxu0 %v706_v57 }
  0x80   :  { %660 = vmatprep.subr.bf16.mxu1 %v829_v0  ;;  %708 = vmatprep.subr.bf16.mxu0 %v829_v0 }
  0x87   :  { %662 = vmatpush3.bf16.xpose.msra.mxu1 %v661_v62  ;;  %710 = vmatpush3.bf16.xpose.msra.mxu0 %v709_v63 }
  0x88   :  { %663 = vmatprep.subr.bf16.mxu1 %v829_v0  ;;  %711 = vmatprep.subr.bf16.mxu0 %v829_v0 }
  0x8f   :  { %665 = vmatpush3.bf16.xpose.msra.mxu1 %v664_v5  ;;  %713 = vmatpush3.bf16.xpose.msra.mxu0 %v712_v6 }
  0x90   :  { %666 = vmatprep.subr.bf16.mxu1 %v829_v0  ;;  %714 = vmatprep.subr.bf16.mxu0 %v829_v0 }
  0x97   :  { %668 = vmatpush3.bf16.xpose.msra.mxu1 %v667_v11  ;;  %716 = vmatpush3.bf16.xpose.msra.mxu0 %v715_v12 }
 0x12c   :  { %v155_v13 = vpop.f32.mrb[0].mxu1  ;;  %v317_v14 = vpop.f32.mrb[0].mxu0 }
 0x12d   :  { %v515_v15 = vpop.f32.mrb[1].mxu1  ;;  %549 = vmatmul.mubr.f32.vlgmr.msra.gmra.mrb[2].mxu1 %v155_v13  ;;  %v585_v16 = vpop.f32.mrb[1].mxu0  ;;  %619 = vmatmul.mubr.f32.vlgmr.msra.gmra.mrb[2].mxu0 %v317_v14 }
 0x200   :  { %v225_v17 = vpop.f32.mrb[2].mxu1  ;;  %v387_v18 = vpop.f32.mrb[2].mxu0 }
 0x201   :  { %726 = vtanh.f32 %v225_v17  ;;  %v550_v19 = vpop.f32.mrb[3].mxu1  ;;  %v620_v20 = vpop.f32.mrb[3].mxu0 }
 0x202   :  { %728 = vtanh.f32 %v387_v18 }
 0x20b   :  { %v727_v0 = vpop.eup %726 }
 0x20c   :  { %v729_v21 = vpop.eup %728  ;;  %v230_v22 = vmul.f32 10.0, %v727_v0 }
 0x20d   :  { %v392_v23 = vmul.f32 10.0, %v729_v21 }
 0x20e   :  { %231 = vst [vmem:[#allocation8] sm:$0xff] %v230_v22 }
 0x20f   :  { %394 = vst [vmem:[#allocation8 + $0x8] sm:$0xff] %v392_v23 }
 0x210   :  { %807 = shalt.err (!%p804_p0)
}
 0x211   :  { %s808_s27 = scalar_lea.hbm %s963_s3, 256 }
 0x212   :  { %p809_p1 = scmp.ne.s32.totalorder %s963_s3, %s808_s27  ;;  %p812_p2 = scmp.lt.u32.totalorder %s808_s27, %s963_s3 }
 0x214   :  { %p814_p3 = pnand %p812_p2, %p809_p1 }
 0x216   :  { %817 = shalt.err (!%p814_p3)
}
 0x217   :  { %406 = dma.vmem_to_hbm [thread:$0]  %s401_s21, 256, %s963_s3, [#allocation4], %s826_s24, %s826_s24, %s827_s25  }
 0x218   :  { %822 = dma.done.wait [#allocation4], 256  }
 0x219   :  { %823 = vsyncadd [#allocation4], 4294967040 }
 0x21a   :  { %410 = vsyncpa [#allocation3], 1 }
 0x21b   :  { %411 = vsyncpa [#allocation6], 1 }
 0x21c   :  { %412 = vsyncpa [#allocation4], 1 }

</bundles_post_ra>
